<compile_context>
chip_gen: v5e
topology: v5e:2x2
jax: 0.10.0
libtpu: 0.0.40
codegen_flags: <defaults>
</compile_context>

<pallas_src>
import functools

import jax
import jax.numpy as jnp
from jax import lax
from jax.experimental import pallas as pl
from jax.experimental.pallas import tpu as pltpu


# ----------------------------------------------------------------------------
# LSTM: single invocation, internal time loop, h/c carried in VMEM scratch.
# Gate order follows PyTorch: i, f, g, o.  Weights are kept in PyTorch layout
# (4H, E)/(4H, H); the transpose is folded into dot_general (no HBM copy).
# ----------------------------------------------------------------------------
def _lstm_kernel(x_ref, wih_ref, whh_ref, b_ref, out_ref, h_scr, c_scr):
    T = x_ref.shape[0]
    H = h_scr.shape[-1]

    h_scr[...] = jnp.zeros_like(h_scr)
    c_scr[...] = jnp.zeros_like(c_scr)

    # Hoist the (loop-invariant) weight loads out of the recurrence.
    w_ih = wih_ref[...]          # (4H, E)
    w_hh = whh_ref[...]          # (4H, H)
    bias = b_ref[...]            # (1, 4H)
    dn = (((1,), (1,)), ((), ()))  # contract last dims: x @ W^T

    @pl.loop(0, T)
    def _(t):
        x_t = x_ref[t]           # (B, E)   dynamic leading-dim index
        h = h_scr[...]
        c = c_scr[...]

        z = (lax.dot_general(x_t, w_ih, dn, preferred_element_type=jnp.float32)
             + lax.dot_general(h, w_hh, dn, preferred_element_type=jnp.float32)
             + bias)             # (B, 4H)

        # NOTE: lane-aligned only when H % 128 == 0 (fine at toy H=32).
        i_g = jax.nn.sigmoid(z[:, 0 * H:1 * H])
        f_g = jax.nn.sigmoid(z[:, 1 * H:2 * H])
        g_g = jnp.tanh(z[:, 2 * H:3 * H])
        o_g = jax.nn.sigmoid(z[:, 3 * H:4 * H])

        c_new = f_g * c + i_g * g_g
        h_new = o_g * jnp.tanh(c_new)

        c_scr[...] = c_new
        h_scr[...] = h_new
        out_ref[t] = h_new       # (B, H)   dynamic leading-dim store


def lstm_pallas(x_tbe, w_ih, w_hh, bias):
    """x_tbe: (T, B, E); w_ih: (4H, E); w_hh: (4H, H); bias: (1, 4H)."""
    T, B, E = x_tbe.shape
    H = w_hh.shape[1]
    return pl.pallas_call(
        _lstm_kernel,
        out_shape=jax.ShapeDtypeStruct((T, B, H), jnp.float32),
        grid=(1,),
        in_specs=[
            pl.BlockSpec((T, B, E), lambda i: (0, 0, 0)),
            pl.BlockSpec((4 * H, E), lambda i: (0, 0)),
            pl.BlockSpec((4 * H, H), lambda i: (0, 0)),
            pl.BlockSpec((1, 4 * H), lambda i: (0, 0)),
        ],
        out_specs=pl.BlockSpec((T, B, H), lambda i: (0, 0, 0)),
        scratch_shapes=[
            pltpu.VMEM((B, H), jnp.float32),
            pltpu.VMEM((B, H), jnp.float32),
        ],
        compiler_params=pltpu.CompilerParams(
            dimension_semantics=("arbitrary",)),
    )(x_tbe, w_ih, w_hh, bias)


# ----------------------------------------------------------------------------
# Tiled tied projection: logits = x @ emb_w.T   (emb_w passed untransposed)
# ----------------------------------------------------------------------------
def _pick_tile(n, preferred, align):
    """Largest tile <= preferred that divides n and is a multiple of `align`
    (falls back to the full extent for small/awkward sizes)."""
    if n <= preferred:
        return n
    t = (preferred // align) * align
    while t >= align:
        if n % t == 0:
            return t
        t -= align
    return n


def _proj_kernel(x_ref, w_ref, o_ref):
    o_ref[...] = lax.dot_general(
        x_ref[...], w_ref[...], (((1,), (1,)), ((), ())),
        preferred_element_type=jnp.float32)


def proj_pallas(x, w):
    """x: (N, H); w: (V, H).  Returns logits (N, V) = x @ w.T."""
    N, H = x.shape
    V = w.shape[0]
    tn = _pick_tile(N, 256, 8)
    tv = _pick_tile(V, 512, 128)
    return pl.pallas_call(
        _proj_kernel,
        out_shape=jax.ShapeDtypeStruct((N, V), jnp.float32),
        grid=(N // tn, V // tv),
        in_specs=[
            pl.BlockSpec((tn, H), lambda i, j: (i, 0)),
            pl.BlockSpec((tv, H), lambda i, j: (j, 0)),
        ],
        out_specs=pl.BlockSpec((tn, tv), lambda i, j: (i, j)),
        compiler_params=pltpu.CompilerParams(
            dimension_semantics=("parallel", "parallel")),
    )(x, w)


# ----------------------------------------------------------------------------
# Fused projection + cross-entropy: online logsumexp over vocab tiles plus a
# masked-select of the label logit; only per-token NLL is written to HBM.
# ----------------------------------------------------------------------------
def _proj_ce_kernel(x_ref, w_ref, lab_ref, nll_ref, m_scr, l_scr, t_scr):
    j = pl.program_id(1)                       # vocab-tile index (innermost)

    @pl.when(j == 0)
    def _():
        m_scr[...] = jnp.full_like(m_scr, -jnp.inf)
        l_scr[...] = jnp.zeros_like(l_scr)
        t_scr[...] = jnp.zeros_like(t_scr)

    logits = lax.dot_general(
        x_ref[...], w_ref[...], (((1,), (1,)), ((), ())),
        preferred_element_type=jnp.float32)    # (tn, tv)

    # Online logsumexp.
    m_prev = m_scr[...]                        # (tn, 1)
    m_new = jnp.maximum(m_prev, jnp.max(logits, axis=-1, keepdims=True))
    l_scr[...] = (l_scr[...] * jnp.exp(m_prev - m_new)
                  + jnp.sum(jnp.exp(logits - m_new), axis=-1, keepdims=True))
    m_scr[...] = m_new

    # Label logit for labels that fall inside this vocab tile (mask + reduce,
    # no gather needed).
    tv = logits.shape[-1]
    col = j * tv + lax.broadcasted_iota(jnp.int32, logits.shape, 1)
    hit = col == lab_ref[...]                  # (tn, tv) vs (tn, 1) broadcast
    t_scr[...] += jnp.sum(jnp.where(hit, logits, 0.0), axis=-1, keepdims=True)

    @pl.when(j == pl.num_programs(1) - 1)
    def _():
        nll_ref[...] = (m_scr[...] + jnp.log(l_scr[...])) - t_scr[...]


def proj_ce_pallas(x, w, labels):
    """x: (N, H); w: (V, H); labels: (N, 1) int32 -> per-token NLL (N, 1)."""
    N, H = x.shape
    V = w.shape[0]
    tn = _pick_tile(N, 256, 8)
    tv = _pick_tile(V, 512, 128)
    return pl.pallas_call(
        _proj_ce_kernel,
        out_shape=jax.ShapeDtypeStruct((N, 1), jnp.float32),
        grid=(N // tn, V // tv),
        in_specs=[
            pl.BlockSpec((tn, H), lambda i, j: (i, 0)),
            pl.BlockSpec((tv, H), lambda i, j: (j, 0)),
            pl.BlockSpec((tn, 1), lambda i, j: (i, 0)),
        ],
        out_specs=pl.BlockSpec((tn, 1), lambda i, j: (i, 0)),
        scratch_shapes=[
            pltpu.VMEM((tn, 1), jnp.float32),
            pltpu.VMEM((tn, 1), jnp.float32),
            pltpu.VMEM((tn, 1), jnp.float32),
        ],
        compiler_params=pltpu.CompilerParams(
            dimension_semantics=("parallel", "arbitrary")),
    )(x, w, labels)


# ----------------------------------------------------------------------------
# Model wrapper (matches the PyTorch forward semantics)
# ----------------------------------------------------------------------------
def init_params(key, vocab_size, emb_dim):
    k_emb, k_wih, k_whh, k_bih, k_bhh = jax.random.split(key, 5)
    H = emb_dim
    bound = 1.0 / jnp.sqrt(H)
    return {
        "emb": jax.random.normal(k_emb, (vocab_size, emb_dim), jnp.float32),
        "w_ih": jax.random.uniform(k_wih, (4 * H, emb_dim), jnp.float32,
                                   -bound, bound),
        "w_hh": jax.random.uniform(k_whh, (4 * H, H), jnp.float32,
                                   -bound, bound),
        "b_ih": jax.random.uniform(k_bih, (4 * H,), jnp.float32, -bound, bound),
        "b_hh": jax.random.uniform(k_bhh, (4 * H,), jnp.float32, -bound, bound),
    }


@functools.partial(jax.jit, static_argnames=("with_labels",))
def model_forward(params, text_ids, label_ids=None, *, with_labels=False):
    emb_w = params["emb"]                       # (V, E)
    V, E = emb_w.shape
    B, T = text_ids.shape
    H = E

    # Embedding gather emitted directly in time-major layout: only the tiny
    # int32 index array is transposed (no HBM round trip of the activations).
    # TODO(synk): fold the gather into the LSTM kernel via scalar-prefetched
    # text_ids + per-row DMA to also skip the (T,B,E) HBM intermediate.
    x_tbe = jnp.take(emb_w, text_ids.T, axis=0)              # (T, B, E)

    bias = (params["b_ih"] + params["b_hh"]).reshape(1, 4 * H)
    h_tbh = lstm_pallas(x_tbe, params["w_ih"], params["w_hh"], bias)  # (T,B,H)
    h_rows = h_tbh.reshape(T * B, H)            # free reshape, rows are (t, b)

    if with_labels:
        # Fused tied-projection + CE: logits never materialized in HBM.
        labels_tb = label_ids.T.reshape(T * B, 1).astype(jnp.int32)
        nll = proj_ce_pallas(h_rows, emb_w, labels_tb)        # (T*B, 1)
        return jnp.mean(nll)
    else:
        logits = proj_pallas(h_rows, emb_w)                   # (T*B, V)
        logits_btv = jnp.transpose(logits.reshape(T, B, V), (1, 0, 2))
        # TODO(synk): argsort has no Pallas primitive on TPU; done in XLA.
        return jnp.argsort(logits_btv, axis=-1)


# ----------------------------------------------------------------------------
# Pure-JAX reference (for a sanity check of the loss path)
# ----------------------------------------------------------------------------
def _reference_loss(params, text_ids, label_ids):
    emb_w = params["emb"]
    V, E = emb_w.shape
    H = E
    B, T = text_ids.shape
    emb = emb_w[text_ids]                                      # (B, T, E)
    w_ih, w_hh = params["w_ih"], params["w_hh"]
    b = params["b_ih"] + params["b_hh"]

    def cell(carry, x_t):
        h, c = carry
        z = x_t @ w_ih.T + h @ w_hh.T + b
        i = jax.nn.sigmoid(z[:, :H])
        f = jax.nn.sigmoid(z[:, H:2 * H])
        g = jnp.tanh(z[:, 2 * H:3 * H])
        o = jax.nn.sigmoid(z[:, 3 * H:])
        c = f * c + i * g
        h = o * jnp.tanh(c)
        return (h, c), h

    h0 = jnp.zeros((B, H), jnp.float32)
    c0 = jnp.zeros((B, H), jnp.float32)
    _, hs = lax.scan(cell, (h0, c0), jnp.transpose(emb, (1, 0, 2)))
    lstm_out = jnp.transpose(hs, (1, 0, 2)).reshape(-1, H)     # (B*T, H)
    logits = lstm_out @ emb_w.T
    logp = jax.nn.log_softmax(logits, axis=-1)
    labels = label_ids.reshape(-1)
    return -jnp.mean(jnp.take_along_axis(logp, labels[:, None], axis=1))


if __name__ == "__main__":
    vocab_size = 64
    emb_dim = 32
    B, T = 2, 8

    key = jax.random.PRNGKey(0)
    k_p, k_x, k_y = jax.random.split(key, 3)

    params = init_params(k_p, vocab_size, emb_dim)
    text_ids = jax.random.randint(k_x, (B, T), 0, vocab_size, dtype=jnp.int32)
    label_ids = jax.random.randint(k_y, (B, T), 0, vocab_size, dtype=jnp.int32)

    # Training-style call: scalar CE loss (fused projection+CE kernel).
    loss = jax.block_until_ready(
        model_forward(params, text_ids, label_ids, with_labels=True))

    # Inference-style call: argsort of tied-projection logits, (B, T, V).
    ranks = jax.block_until_ready(
        model_forward(params, text_ids, with_labels=False))

    # Sanity check against a pure-JAX reference (loose tol: matmul precision
    # paths differ between XLA and the Pallas MXU kernels).
    ref_loss = jax.block_until_ready(
        jax.jit(_reference_loss)(params, text_ids, label_ids))

    assert loss.shape == ()
    assert ranks.shape == (B, T, vocab_size)
    assert jnp.isfinite(loss)
    assert abs(float(loss) - float(ref_loss)) < 5e-2, (loss, ref_loss)
    print("KERNEL_OK")
</pallas_src>

<mosaic_0001>
module attributes {stable_mosaic.version = 11 : i64} {
  func.func @_lstm_kernel(%arg0: i32, %arg1: memref<8x2x32xf32, #tpu.memory_space<vmem>>, %arg2: memref<128x32xf32, #tpu.memory_space<vmem>>, %arg3: memref<128x32xf32, #tpu.memory_space<vmem>>, %arg4: memref<1x128xf32, #tpu.memory_space<vmem>>, %arg5: memref<8x2x32xf32, #tpu.memory_space<vmem>>, %arg6: memref<2x32xf32, #tpu.memory_space<vmem>>, %arg7: memref<2x32xf32, #tpu.memory_space<vmem>>) attributes {dimension_semantics = [#tpu.dimension_semantics<arbitrary>], iteration_bounds = array<i64: 1>, scalar_prefetch = 0 : i64, scratch_operands = 2 : i64, tpu.core_type = #tpu.core_type<tc>, window_params = [{pipeline_mode = #tpu.pipeline_mode<synchronous>, transform_indices = @transform_0, window_bounds = array<i64: 8, 2, 32>}, {pipeline_mode = #tpu.pipeline_mode<synchronous>, transform_indices = @transform_1, window_bounds = array<i64: 128, 32>}, {pipeline_mode = #tpu.pipeline_mode<synchronous>, transform_indices = @transform_2, window_bounds = array<i64: 128, 32>}, {pipeline_mode = #tpu.pipeline_mode<synchronous>, transform_indices = @transform_3, window_bounds = array<i64: 1, 128>}, {pipeline_mode = #tpu.pipeline_mode<synchronous>, transform_indices = @transform_4, window_bounds = array<i64: 8, 2, 32>}]} {
    %cst = arith.constant 0.000000e+00 : f32
    %0 = vector.broadcast %cst : f32 to vector<2x32xf32>
    %c0 = arith.constant 0 : index
    %c0_0 = arith.constant 0 : index
    %1 = vector.load %arg6[%c0, %c0_0] : memref<2x32xf32, #tpu.memory_space<vmem>>, vector<2x32xf32>
    tpu.vector_store %arg6[%c0, %c0_0], %0 {strides = array<i32>} : memref<2x32xf32, #tpu.memory_space<vmem>>, vector<2x32xf32>,
    %cst_1 = arith.constant 0.000000e+00 : f32
    %2 = vector.broadcast %cst_1 : f32 to vector<2x32xf32>
    %c0_2 = arith.constant 0 : index
    %c0_3 = arith.constant 0 : index
    %3 = vector.load %arg7[%c0_2, %c0_3] : memref<2x32xf32, #tpu.memory_space<vmem>>, vector<2x32xf32>
    tpu.vector_store %arg7[%c0_2, %c0_3], %2 {strides = array<i32>} : memref<2x32xf32, #tpu.memory_space<vmem>>, vector<2x32xf32>,
    %c0_4 = arith.constant 0 : index
    %c0_5 = arith.constant 0 : index
    %4 = vector.load %arg2[%c0_4, %c0_5] : memref<128x32xf32, #tpu.memory_space<vmem>>, vector<128x32xf32>
    %c0_6 = arith.constant 0 : index
    %c0_7 = arith.constant 0 : index
    %5 = vector.load %arg3[%c0_6, %c0_7] : memref<128x32xf32, #tpu.memory_space<vmem>>, vector<128x32xf32>
    %c0_8 = arith.constant 0 : index
    %c0_9 = arith.constant 0 : index
    %6 = vector.load %arg4[%c0_8, %c0_9] : memref<1x128xf32, #tpu.memory_space<vmem>>, vector<1x128xf32>
    %c0_i32 = arith.constant 0 : i32
    %c8_i32 = arith.constant 8 : i32
    %7 = arith.addi %c0_i32, %c8_i32 : i32
    %c1_i32 = arith.constant 1 : i32
    scf.for %arg8 = %c0_i32 to %7 step %c1_i32  : i32 {
      %c1_i32_11 = arith.constant 1 : i32
      %8 = arith.muli %arg8, %c1_i32_11 : i32
      %c0_i32_12 = arith.constant 0 : i32
      %9 = arith.addi %c0_i32_12, %8 : i32
      %10 = arith.index_cast %9 : i32 to index
      %c0_13 = arith.constant 0 : index
      %c0_14 = arith.constant 0 : index
      %11 = vector.load %arg1[%10, %c0_13, %c0_14] : memref<8x2x32xf32, #tpu.memory_space<vmem>>, vector<1x2x32xf32>
      %12 = vector.shape_cast %11 : vector<1x2x32xf32> to vector<2x32xf32>
      %c0_15 = arith.constant 0 : index
      %c0_16 = arith.constant 0 : index
      %13 = vector.load %arg6[%c0_15, %c0_16] : memref<2x32xf32, #tpu.memory_space<vmem>>, vector<2x32xf32>
      %c0_17 = arith.constant 0 : index
      %c0_18 = arith.constant 0 : index
      %14 = vector.load %arg7[%c0_17, %c0_18] : memref<2x32xf32, #tpu.memory_space<vmem>>, vector<2x32xf32>
      %cst_19 = arith.constant dense<0.000000e+00> : vector<2x128xf32>
      %15 = tpu.matmul %12, %4, %cst_19 {dimension_numbers = #tpu.dot_dimension_numbers<[1], [1], [0], [0], [0, 0, 1, 0], [], []>} : vector<2x32xf32>, vector<128x32xf32>, vector<2x128xf32> -> vector<2x128xf32>
      %cst_20 = arith.constant dense<0.000000e+00> : vector<2x128xf32>
      %16 = tpu.matmul %13, %5, %cst_20 {dimension_numbers = #tpu.dot_dimension_numbers<[1], [1], [0], [0], [0, 0, 1, 0], [], []>} : vector<2x32xf32>, vector<128x32xf32>, vector<2x128xf32> -> vector<2x128xf32>
      %17 = arith.addf %15, %16 : vector<2x128xf32>
      %18 = vector.broadcast %6 : vector<1x128xf32> to vector<2x128xf32>
      %19 = arith.addf %17, %18 : vector<2x128xf32>
      %20 = vector.extract_strided_slice %19 {offsets = [0, 0], sizes = [2, 32], strides = [1, 1]} : vector<2x128xf32> to vector<2x32xf32>
      %21 = arith.negf %20 : vector<2x32xf32>
      %22 = math.exp %21 : vector<2x32xf32>
      %cst_21 = arith.constant 1.000000e+00 : f32
      %23 = vector.broadcast %cst_21 : f32 to vector<2x32xf32>
      %24 = arith.addf %23, %22 : vector<2x32xf32>
      %25 = arith.divf %23, %24 : vector<2x32xf32>
      %26 = vector.extract_strided_slice %19 {offsets = [0, 32], sizes = [2, 32], strides = [1, 1]} : vector<2x128xf32> to vector<2x32xf32>
      %27 = arith.negf %26 : vector<2x32xf32>
      %28 = math.exp %27 : vector<2x32xf32>
      %cst_22 = arith.constant 1.000000e+00 : f32
      %29 = vector.broadcast %cst_22 : f32 to vector<2x32xf32>
      %30 = arith.addf %29, %28 : vector<2x32xf32>
      %31 = arith.divf %29, %30 : vector<2x32xf32>
      %32 = vector.extract_strided_slice %19 {offsets = [0, 64], sizes = [2, 32], strides = [1, 1]} : vector<2x128xf32> to vector<2x32xf32>
      %33 = math.tanh %32 : vector<2x32xf32>
      %34 = vector.extract_strided_slice %19 {offsets = [0, 96], sizes = [2, 32], strides = [1, 1]} : vector<2x128xf32> to vector<2x32xf32>
      %35 = arith.negf %34 : vector<2x32xf32>
      %36 = math.exp %35 : vector<2x32xf32>
      %cst_23 = arith.constant 1.000000e+00 : f32
      %37 = vector.broadcast %cst_23 : f32 to vector<2x32xf32>
      %38 = arith.addf %37, %36 : vector<2x32xf32>
      %39 = arith.divf %37, %38 : vector<2x32xf32>
      %40 = arith.mulf %31, %14 : vector<2x32xf32>
      %41 = arith.mulf %25, %33 : vector<2x32xf32>
      %42 = arith.addf %40, %41 : vector<2x32xf32>
      %43 = math.tanh %42 : vector<2x32xf32>
      %44 = arith.mulf %39, %43 : vector<2x32xf32>
      %c0_24 = arith.constant 0 : index
      %c0_25 = arith.constant 0 : index
      %45 = vector.load %arg7[%c0_24, %c0_25] : memref<2x32xf32, #tpu.memory_space<vmem>>, vector<2x32xf32>
      tpu.vector_store %arg7[%c0_24, %c0_25], %42 {strides = array<i32>} : memref<2x32xf32, #tpu.memory_space<vmem>>, vector<2x32xf32>,
      %c0_26 = arith.constant 0 : index
      %c0_27 = arith.constant 0 : index
      %46 = vector.load %arg6[%c0_26, %c0_27] : memref<2x32xf32, #tpu.memory_space<vmem>>, vector<2x32xf32>
      tpu.vector_store %arg6[%c0_26, %c0_27], %44 {strides = array<i32>} : memref<2x32xf32, #tpu.memory_space<vmem>>, vector<2x32xf32>,
      %47 = arith.index_cast %9 : i32 to index
      %c0_28 = arith.constant 0 : index
      %c0_29 = arith.constant 0 : index
      %48 = vector.load %arg5[%47, %c0_28, %c0_29] : memref<8x2x32xf32, #tpu.memory_space<vmem>>, vector<1x2x32xf32>
      %49 = vector.shape_cast %48 : vector<1x2x32xf32> to vector<2x32xf32>
      %50 = vector.shape_cast %44 : vector<2x32xf32> to vector<1x2x32xf32>
      tpu.vector_store %arg5[%47, %c0_28, %c0_29], %50 {strides = array<i32>} : memref<8x2x32xf32, #tpu.memory_space<vmem>>, vector<1x2x32xf32>,
    }
    %c8_i32_10 = arith.constant 8 : i32
    return
  }
  func.func @transform_0(%arg0: i32) -> (i32, i32, i32) {
    %c0_i32 = arith.constant 0 : i32
    %c0_i32_0 = arith.constant 0 : i32
    %c0_i32_1 = arith.constant 0 : i32
    %c0_i32_2 = arith.constant 0 : i32
    return %c0_i32, %c0_i32_0, %c0_i32_1 : i32, i32, i32
  }
  func.func @transform_1(%arg0: i32) -> (i32, i32) {
    %c0_i32 = arith.constant 0 : i32
    %c0_i32_0 = arith.constant 0 : i32
    %c0_i32_1 = arith.constant 0 : i32
    return %c0_i32, %c0_i32_0 : i32, i32
  }
  func.func @transform_2(%arg0: i32) -> (i32, i32) {
    %c0_i32 = arith.constant 0 : i32
    %c0_i32_0 = arith.constant 0 : i32
    %c0_i32_1 = arith.constant 0 : i32
    return %c0_i32, %c0_i32_0 : i32, i32
  }
  func.func @transform_3(%arg0: i32) -> (i32, i32) {
    %c0_i32 = arith.constant 0 : i32
    %c0_i32_0 = arith.constant 0 : i32
    %c0_i32_1 = arith.constant 0 : i32
    return %c0_i32, %c0_i32_0 : i32, i32
  }
  func.func @transform_4(%arg0: i32) -> (i32, i32, i32) {
    %c0_i32 = arith.constant 0 : i32
    %c0_i32_0 = arith.constant 0 : i32
    %c0_i32_1 = arith.constant 0 : i32
    %c0_i32_2 = arith.constant 0 : i32
    return %c0_i32, %c0_i32_0, %c0_i32_1 : i32, i32, i32
  }
}

module attributes {stable_mosaic.version = 11 : i64} {
  func.func @_proj_ce_kernel(%arg0: i32, %arg1: i32, %arg2: memref<16x32xf32, #tpu.memory_space<vmem>>, %arg3: memref<64x32xf32, #tpu.memory_space<vmem>>, %arg4: memref<16x1xi32, #tpu.memory_space<vmem>>, %arg5: memref<16x1xf32, #tpu.memory_space<vmem>>, %arg6: memref<16x1xf32, #tpu.memory_space<vmem>>, %arg7: memref<16x1xf32, #tpu.memory_space<vmem>>, %arg8: memref<16x1xf32, #tpu.memory_space<vmem>>) attributes {dimension_semantics = [#tpu.dimension_semantics<parallel>, #tpu.dimension_semantics<arbitrary>], iteration_bounds = array<i64: 1, 1>, scalar_prefetch = 0 : i64, scratch_operands = 3 : i64, tpu.core_type = #tpu.core_type<tc>, window_params = [{transform_indices = @transform_0, window_bounds = array<i64: 16, 32>}, {transform_indices = @transform_1, window_bounds = array<i64: 64, 32>}, {transform_indices = @transform_2, window_bounds = array<i64: 16, 1>}, {transform_indices = @transform_3, window_bounds = array<i64: 16, 1>}]} {
    %c0_i32 = arith.constant 0 : i32
    %0 = arith.cmpi eq, %arg1, %c0_i32 : i32
    %1 = arith.extui %0 : i1 to i32
    %c0_i32_0 = arith.constant 0 : i32
    %2 = arith.cmpi ne, %1, %c0_i32_0 : i32
    scf.if %2 {
      %cst_24 = arith.constant 0xFF800000 : f32
      %39 = vector.broadcast %cst_24 : f32 to vector<16x1xf32>
      %c0_25 = arith.constant 0 : index
      %c0_26 = arith.constant 0 : index
      %40 = vector.load %arg6[%c0_25, %c0_26] : memref<16x1xf32, #tpu.memory_space<vmem>>, vector<16x1xf32>
      tpu.vector_store %arg6[%c0_25, %c0_26], %39 {strides = array<i32>} : memref<16x1xf32, #tpu.memory_space<vmem>>, vector<16x1xf32>,
      %cst_27 = arith.constant 0.000000e+00 : f32
      %41 = vector.broadcast %cst_27 : f32 to vector<16x1xf32>
      %c0_28 = arith.constant 0 : index
      %c0_29 = arith.constant 0 : index
      %42 = vector.load %arg7[%c0_28, %c0_29] : memref<16x1xf32, #tpu.memory_space<vmem>>, vector<16x1xf32>
      tpu.vector_store %arg7[%c0_28, %c0_29], %41 {strides = array<i32>} : memref<16x1xf32, #tpu.memory_space<vmem>>, vector<16x1xf32>,
      %cst_30 = arith.constant 0.000000e+00 : f32
      %43 = vector.broadcast %cst_30 : f32 to vector<16x1xf32>
      %c0_31 = arith.constant 0 : index
      %c0_32 = arith.constant 0 : index
      %44 = vector.load %arg8[%c0_31, %c0_32] : memref<16x1xf32, #tpu.memory_space<vmem>>, vector<16x1xf32>
      tpu.vector_store %arg8[%c0_31, %c0_32], %43 {strides = array<i32>} : memref<16x1xf32, #tpu.memory_space<vmem>>, vector<16x1xf32>,
    } else {
    }
    %c0 = arith.constant 0 : index
    %c0_1 = arith.constant 0 : index
    %3 = vector.load %arg2[%c0, %c0_1] : memref<16x32xf32, #tpu.memory_space<vmem>>, vector<16x32xf32>
    %c0_2 = arith.constant 0 : index
    %c0_3 = arith.constant 0 : index
    %4 = vector.load %arg3[%c0_2, %c0_3] : memref<64x32xf32, #tpu.memory_space<vmem>>, vector<64x32xf32>
    %cst = arith.constant dense<0.000000e+00> : vector<16x64xf32>
    %5 = tpu.matmul %3, %4, %cst {dimension_numbers = #tpu.dot_dimension_numbers<[1], [1], [0], [0], [0, 0, 1, 0], [], []>} : vector<16x32xf32>, vector<64x32xf32>, vector<16x64xf32> -> vector<16x64xf32>
    %c0_4 = arith.constant 0 : index
    %c0_5 = arith.constant 0 : index
    %6 = vector.load %arg6[%c0_4, %c0_5] : memref<16x1xf32, #tpu.memory_space<vmem>>, vector<16x1xf32>
    %cst_6 = arith.constant dense<0xFF800000> : vector<16xf32>
    %7 = vector.multi_reduction <maximumf>, %5, %cst_6 [1] : vector<16x64xf32> to vector<16xf32>
    %8 = vector.shape_cast %7 : vector<16xf32> to vector<16x1xf32>
    %9 = arith.maximumf %6, %8 : vector<16x1xf32>
    %c0_7 = arith.constant 0 : index
    %c0_8 = arith.constant 0 : index
    %10 = vector.load %arg7[%c0_7, %c0_8] : memref<16x1xf32, #tpu.memory_space<vmem>>, vector<16x1xf32>
    %11 = arith.subf %6, %9 : vector<16x1xf32>
    %12 = math.exp %11 : vector<16x1xf32>
    %13 = arith.mulf %10, %12 : vector<16x1xf32>
    %14 = vector.broadcast %9 : vector<16x1xf32> to vector<16x64xf32>
    %15 = arith.subf %5, %14 : vector<16x64xf32>
    %16 = math.exp %15 : vector<16x64xf32>
    %cst_9 = arith.constant dense<0.000000e+00> : vector<16xf32>
    %17 = vector.multi_reduction <add>, %16, %cst_9 [1] : vector<16x64xf32> to vector<16xf32>
    %18 = vector.shape_cast %17 : vector<16xf32> to vector<16x1xf32>
    %19 = arith.addf %13, %18 : vector<16x1xf32>
    %c0_10 = arith.constant 0 : index
    %c0_11 = arith.constant 0 : index
    %20 = vector.load %arg7[%c0_10, %c0_11] : memref<16x1xf32, #tpu.memory_space<vmem>>, vector<16x1xf32>
    tpu.vector_store %arg7[%c0_10, %c0_11], %19 {strides = array<i32>} : memref<16x1xf32, #tpu.memory_space<vmem>>, vector<16x1xf32>,
    %c0_12 = arith.constant 0 : index
    %c0_13 = arith.constant 0 : index
    %21 = vector.load %arg6[%c0_12, %c0_13] : memref<16x1xf32, #tpu.memory_space<vmem>>, vector<16x1xf32>
    tpu.vector_store %arg6[%c0_12, %c0_13], %9 {strides = array<i32>} : memref<16x1xf32, #tpu.memory_space<vmem>>, vector<16x1xf32>,
    %c64_i32 = arith.constant 64 : i32
    %22 = arith.muli %arg1, %c64_i32 : i32
    %23 = tpu.iota {dimensions = array<i32: 1>} : vector<16x64xi32>
    %24 = vector.broadcast %22 : i32 to vector<16x64xi32>
    %25 = arith.addi %24, %23 : vector<16x64xi32>
    %c0_14 = arith.constant 0 : index
    %c0_15 = arith.constant 0 : index
    %26 = vector.load %arg4[%c0_14, %c0_15] : memref<16x1xi32, #tpu.memory_space<vmem>>, vector<16x1xi32>
    %27 = vector.broadcast %26 : vector<16x1xi32> to vector<16x64xi32>
    %28 = arith.cmpi eq, %25, %27 : vector<16x64xi32>
    %c0_16 = arith.constant 0 : index
    %c0_17 = arith.constant 0 : index
    %29 = vector.load %arg8[%c0_16, %c0_17] : memref<16x1xf32, #tpu.memory_space<vmem>>, vector<16x1xf32>
    %cst_18 = arith.constant 0.000000e+00 : f32
    %30 = vector.broadcast %cst_18 : f32 to vector<16x64xf32>
    %31 = arith.select %28, %5, %30 : vector<16x64xi1>, vector<16x64xf32>
    %cst_19 = arith.constant dense<0.000000e+00> : vector<16xf32>
    %32 = vector.multi_reduction <add>, %31, %cst_19 [1] : vector<16x64xf32> to vector<16xf32>
    %33 = vector.shape_cast %32 : vector<16xf32> to vector<16x1xf32>
    %34 = arith.addf %29, %33 : vector<16x1xf32>
    %c0_20 = arith.constant 0 : index
    %c0_21 = arith.constant 0 : index
    %35 = vector.load %arg8[%c0_20, %c0_21] : memref<16x1xf32, #tpu.memory_space<vmem>>, vector<16x1xf32>
    tpu.vector_store %arg8[%c0_20, %c0_21], %34 {strides = array<i32>} : memref<16x1xf32, #tpu.memory_space<vmem>>, vector<16x1xf32>,
    %c0_i32_22 = arith.constant 0 : i32
    %36 = arith.cmpi eq, %arg1, %c0_i32_22 : i32
    %37 = arith.extui %36 : i1 to i32
    %c0_i32_23 = arith.constant 0 : i32
    %38 = arith.cmpi ne, %37, %c0_i32_23 : i32
    scf.if %38 {
      %c0_24 = arith.constant 0 : index
      %c0_25 = arith.constant 0 : index
      %39 = vector.load %arg6[%c0_24, %c0_25] : memref<16x1xf32, #tpu.memory_space<vmem>>, vector<16x1xf32>
      %c0_26 = arith.constant 0 : index
      %c0_27 = arith.constant 0 : index
      %40 = vector.load %arg7[%c0_26, %c0_27] : memref<16x1xf32, #tpu.memory_space<vmem>>, vector<16x1xf32>
      %41 = math.log %40 : vector<16x1xf32>
      %42 = arith.addf %39, %41 : vector<16x1xf32>
      %c0_28 = arith.constant 0 : index
      %c0_29 = arith.constant 0 : index
      %43 = vector.load %arg8[%c0_28, %c0_29] : memref<16x1xf32, #tpu.memory_space<vmem>>, vector<16x1xf32>
      %44 = arith.subf %42, %43 : vector<16x1xf32>
      %c0_30 = arith.constant 0 : index
      %c0_31 = arith.constant 0 : index
      %45 = vector.load %arg5[%c0_30, %c0_31] : memref<16x1xf32, #tpu.memory_space<vmem>>, vector<16x1xf32>
      tpu.vector_store %arg5[%c0_30, %c0_31], %44 {strides = array<i32>} : memref<16x1xf32, #tpu.memory_space<vmem>>, vector<16x1xf32>,
    } else {
    }
    return
  }
  func.func @transform_0(%arg0: i32, %arg1: i32) -> (i32, i32) {
    %c0_i32 = arith.constant 0 : i32
    %c0_i32_0 = arith.constant 0 : i32
    return %arg0, %c0_i32 : i32, i32
  }
  func.func @transform_1(%arg0: i32, %arg1: i32) -> (i32, i32) {
    %c0_i32 = arith.constant 0 : i32
    %c0_i32_0 = arith.constant 0 : i32
    return %arg1, %c0_i32 : i32, i32
  }
  func.func @transform_2(%arg0: i32, %arg1: i32) -> (i32, i32) {
    %c0_i32 = arith.constant 0 : i32
    %c0_i32_0 = arith.constant 0 : i32
    return %arg0, %c0_i32 : i32, i32
  }
  func.func @transform_3(%arg0: i32, %arg1: i32) -> (i32, i32) {
    %c0_i32 = arith.constant 0 : i32
    %c0_i32_0 = arith.constant 0 : i32
    return %arg0, %c0_i32 : i32, i32
  }
}

</mosaic_0001>

<bundles_post_ra>
// kernel: model_forward.3
= control target key start
LH: loop header
LB: loop body
LE: loop exit
PB: predicated region body
PF: predicated region fallthrough
CT: control target
= control target key end

     0   :  { %vm35_vm0 = vcmask 261120   ;;  %v227_v2 = vmov 0   ;;  %vm18_vm1 = vcmask 7168   ;;  %v228_v13 = vmov -inf   ;;  %s330_s1 = inlined_call_operand.vmem [shape: f32[64,32], index: 1, kind: input, shape index: {}]   ;;  %s331_s2 = inlined_call_operand.vmem [shape: s32[16,1], index: 2, kind: input, shape index: {}]   ;;  %s332_s0 = inlined_call_operand.vmem [shape: f32[16,32], index: 0, kind: input, shape index: {}]   ;;  %s333_s3 = inlined_call_operand.vmem [shape: f32[16,1], index: 3, kind: output, shape index: {}]  }
   0x1   :  { %v34_v0 = vld [vmem:[%s330_s1 + $0x38] sm:$0xff]  ;;  %v33_v1 = vld [vmem:[%s330_s1 + $0x30] sm:$0xff]  ;;  %213 = vset.pattern.permute.xlu2 %v227_v2  ;;  %212 = vset.pattern.permute.xlu1 %v227_v2  ;;  %v144_v3 = vld [vmem:[%s331_s2] sm:$0xff]  ;;  %19 = vst.msk [vmem:[#allocation2] sm:$0xff] %vm18_vm1, %v228_v13  ;;  %v140_v14 = vlaneseq  ;;  %vm91_vm3 = vcmask 523264   ;;  %v229_v23 = vmov 0.0  }
   0x2   :  { %191 = vmatpush.xpose.msk.msra.mxu0 %vm35_vm0, %v34_v0  ;;  %201 = vmatpush.xpose.msk.msra.mxu1 %vm35_vm0, %v34_v0  ;;  %v32_v4 = vld [vmem:[%s330_s1 + $0x28] sm:$0xff]  ;;  %v31_v6 = vld [vmem:[%s330_s1 + $0x20] sm:$0xff]  ;;  %v30_v7 = vld [vmem:[%s330_s1 + $0x18] sm:$0xff]  ;;  %20 = vst.msk [vmem:[#allocation2 + $0x8] sm:$0xff] %vm18_vm1, %v228_v13 }
   0x3   :  { %214 = vset.pattern.permute.xlu0 %v227_v2  ;;  %147 = vperm.xlu2 %213, %v144_v3   ;;  %v145_v5 = vld [vmem:[%s331_s2 + $0x8] sm:$0xff]  ;;  %v29_v8 = vld [vmem:[%s330_s1 + $0x10] sm:$0xff]  ;;  %v27_v10 = vld [vmem:[%s330_s1] sm:$0xff]  ;;  %v141_v15 = vand.u32 127, %v140_v14  ;;  %23 = vst.msk [vmem:[#allocation4] sm:$0xff] %vm18_vm1, %v229_v23 }
   0x4   :  { %v28_v9 = vld [vmem:[%s330_s1 + $0x8] sm:$0xff]  ;;  %v25_v11 = vld [vmem:[%s332_s0] sm:$0xff]  ;;  %21 = vst.msk [vmem:[#allocation3] sm:$0xff] %vm18_vm1, %v229_v23 }
   0x5   :  { %v26_v12 = vld [vmem:[%s332_s0 + $0x8] sm:$0xff]  ;;  %22 = vst.msk [vmem:[#allocation3 + $0x8] sm:$0xff] %vm18_vm1, %v229_v23 }
   0x6   :  { %192 = vmatpush.xpose.msk.msra.mxu0 %vm35_vm0, %v33_v1  ;;  %202 = vmatpush.xpose.msk.msra.mxu1 %vm35_vm0, %v33_v1  ;;  %24 = vst.msk [vmem:[#allocation4 + $0x8] sm:$0xff] %vm18_vm1, %v229_v23 }
   0x8   :  { %v89_v25 = vld [vmem:[#allocation2] sm:$0xff] }
   0x9   :  { %v90_v32 = vld [vmem:[#allocation2 + $0x8] sm:$0xff] }
   0xa   :  { %193 = vmatpush.xpose.msk.msra.mxu0 %vm35_vm0, %v32_v4  ;;  %203 = vmatpush.xpose.msk.msra.mxu1 %vm35_vm0, %v32_v4  ;;  %v154_v26 = vld [vmem:[#allocation4] sm:$0xff] }
   0xb   :  { %150 = vperm.xlu2 %213, %v145_v5   ;;  %v100_v51 = vld [vmem:[#allocation3] sm:$0xff] }
   0xc   :  { %v101_v56 = vld [vmem:[#allocation3 + $0x8] sm:$0xff] }
   0xd   :  { %v155_v57 = vld [vmem:[#allocation4 + $0x8] sm:$0xff] }
   0xe   :  { %194 = vmatpush.xpose.msk.msra.mxu0 %vm35_vm0, %v31_v6  ;;  %204 = vmatpush.xpose.msk.msra.mxu1 %vm35_vm0, %v31_v6 }
  0x12   :  { %195 = vmatpush.xpose.msk.msra.mxu0 %vm35_vm0, %v30_v7  ;;  %205 = vmatpush.xpose.msk.msra.mxu1 %vm35_vm0, %v30_v7 }
  0x16   :  { %196 = vmatpush.xpose.msk.msra.mxu0 %vm35_vm0, %v29_v8  ;;  %206 = vmatpush.xpose.msk.msra.mxu1 %vm35_vm0, %v29_v8 }
  0x1a   :  { %197 = vmatpush.xpose.msk.msra.mxu0 %vm35_vm0, %v28_v9  ;;  %207 = vmatpush.xpose.msk.msra.mxu1 %vm35_vm0, %v28_v9 }
  0x1e   :  { %198 = vmatpush.xpose.msk.msra.mxu0 %vm35_vm0, %v27_v10  ;;  %208 = vmatpush.xpose.msk.msra.mxu1 %vm35_vm0, %v27_v10 }
  0x21   :  { %199 = vmatmul.msk.f32.vlgmr.msra.gmra.mxu0 %vm35_vm0, %v25_v11  ;;  %200 = vmatmul.msk.f32.vlgmr.msra.gmra.mxu1 %vm35_vm0, %v26_v12 }
  0x5d   :  { %v148_v16 = vpop.permute.xlu2 %147 }
  0x5e   :  { %vm152_vm2 = vcmp.eq.s32.totalorder %v141_v15, %v148_v16 }
  0x65   :  { %v151_v24 = vpop.permute.xlu2 %150 }
  0x66   :  { %vm153_vm4 = vcmp.eq.s32.totalorder %v141_v15, %v151_v24 }
  0x9e   :  { %v83_v17 = vpop.f32.mrf.mxu0  ;;  %v86_v21 = vpop.f32.mrf.mxu1 }
  0x9f   :  { %v92_v18 = vsel %vm91_vm3, %v83_v17, -inf  ;;  %v156_v19 = vsel %vm152_vm2, %v83_v17, 0.0  ;;  %v95_v22 = vsel %vm91_vm3, %v86_v21, -inf  ;;  %v157_v44 = vsel %vm153_vm4, %v86_v21, 0.0 }
  0xa0   :  { %93 = vmax.xlane.f32.xlu0 %v92_v18  ;;  %v158_v20 = vsel %vm91_vm3, %v156_v19, 0.0  ;;  %v161_v46 = vsel %vm91_vm3, %v157_v44, 0.0 }
  0xa1   :  { %159 = vadd.xlane.f32.xlu2 %v158_v20 }
  0xa8   :  { %96 = vmax.xlane.f32.xlu0 %v95_v22 }
 0x113   :  { %v94_v27 = vpop.xlane.xlu0 %93 }
 0x114   :  { %v98_v28 = vmax.f32 %v89_v25, %v94_v27  ;;  %v160_v29 = vpop.xlane.xlu2 %159 }
 0x115   :  { %v164_v30 = vadd.f32 %v160_v29, %v154_v26 }
 0x116   :  { %v102_v31 = vsub.f32 %v89_v25, %v98_v28  ;;  %137 = vst.msk [vmem:[#allocation2] sm:$0xff] %vm18_vm1, %v98_v28  ;;  %112 = vperm.xlu1 %212, %v98_v28  }
 0x117   :  { %166 = vst.msk [vmem:[#allocation4] sm:$0xff] %vm18_vm1, %v164_v30 }
 0x118   :  { %v104_v48 = vmul.f32 1.442695, %v102_v31 }
 0x11b   :  { %v97_v33 = vpop.xlane.xlu0 %96 }
 0x11c   :  { %v99_v34 = vmax.f32 %v90_v32, %v97_v33 }
 0x11d   :  { %v171_v3 = vld [vmem:[#allocation2] sm:$0xff] }
 0x11e   :  { %v103_v35 = vsub.f32 %v90_v32, %v99_v34  ;;  %138 = vst.msk [vmem:[#allocation2 + $0x8] sm:$0xff] %vm18_vm1, %v99_v34  ;;  %117 = vperm.xlu1 %212, %v99_v34   ;;  %v181_v5 = vld [vmem:[#allocation4] sm:$0xff] }
 0x120   :  { %v106_v49 = vmul.f32 1.442695, %v103_v35 }
 0x125   :  { %v172_v9 = vld [vmem:[#allocation2 + $0x8] sm:$0xff] }
 0x188   :  { %v113_v36 = vpop.permute.xlu1 %112 }
 0x189   :  { %v120_v37 = vsub.f32 %v83_v17, %v113_v36 }
 0x18b   :  { %v122_v38 = vmul.f32 1.442695, %v120_v37 }
 0x18d   :  { %215 = vpow2.f32 %v122_v38 }
 0x190   :  { %v118_v39 = vpop.permute.xlu1 %117 }
 0x191   :  { %v121_v40 = vsub.f32 %v86_v21, %v118_v39 }
 0x193   :  { %v216_v41 = vpop.eup %215  ;;  %v124_v42 = vmul.f32 1.442695, %v121_v40 }
 0x194   :  { %v126_v43 = vsel %vm91_vm3, %v216_v41, 0.0 }
 0x195   :  { %217 = vpow2.f32 %v124_v42  ;;  %127 = vadd.xlane.f32.xlu0 %v126_v43 }
 0x196   :  { %219 = vpow2.f32 %v104_v48 }
 0x197   :  { %221 = vpow2.f32 %v106_v49 }
 0x19b   :  { %v218_v45 = vpop.eup %217 }
 0x19c   :  { %v129_v47 = vsel %vm91_vm3, %v218_v45, 0.0  ;;  %v220_v50 = vpop.eup %219 }
 0x19d   :  { %162 = vadd.xlane.f32.xlu0 %v161_v46  ;;  %130 = vadd.xlane.f32.xlu1 %v129_v47  ;;  %v108_v52 = vmul.f32 %v220_v50, %v100_v51  ;;  %v222_v55 = vpop.eup %221 }
 0x19e   :  { %v109_v58 = vmul.f32 %v222_v55, %v101_v56 }
 0x208   :  { %v128_v53 = vpop.xlane.xlu0 %127 }
 0x209   :  { %v132_v54 = vadd.f32 %v128_v53, %v108_v52 }
 0x20b   :  { %135 = vst.msk [vmem:[#allocation3] sm:$0xff] %vm18_vm1, %v132_v54 }
 0x210   :  { %v131_v59 = vpop.xlane.xlu1 %130  ;;  %v163_v60 = vpop.xlane.xlu0 %162 }
 0x211   :  { %v133_v61 = vadd.f32 %v131_v59, %v109_v58  ;;  %v165_v62 = vadd.f32 %v163_v60, %v155_v57 }
 0x212   :  { %v173_v63 = vld [vmem:[#allocation3] sm:$0xff] }
 0x213   :  { %223 = vlog2.f32 %v173_v63  ;;  %136 = vst.msk [vmem:[#allocation3 + $0x8] sm:$0xff] %vm18_vm1, %v133_v61 }
 0x214   :  { %167 = vst.msk [vmem:[#allocation4 + $0x8] sm:$0xff] %vm18_vm1, %v165_v62 }
 0x219   :  { %v224_v0 = vpop.eup %223 }
 0x21a   :  { %v176_v1 = vmul.f32 0.6931472, %v224_v0  ;;  %v174_v2 = vld [vmem:[#allocation3 + $0x8] sm:$0xff] }
 0x21b   :  { %225 = vlog2.f32 %v174_v2  ;;  %v182_v11 = vld [vmem:[#allocation4 + $0x8] sm:$0xff] }
 0x21c   :  { %v179_v4 = vadd.f32 %v176_v1, %v171_v3 }
 0x21e   :  { %v183_v6 = vsub.f32 %v179_v4, %v181_v5 }
 0x220   :  { %185 = vst.msk [vmem:[%s333_s3] sm:$0xff] %vm18_vm1, %v183_v6 }
 0x221   :  { %v226_v7 = vpop.eup %225 }
 0x222   :  { %v178_v8 = vmul.f32 0.6931472, %v226_v7 }
 0x224   :  { %v180_v10 = vadd.f32 %v178_v8, %v172_v9 }
 0x226   :  { %v184_v12 = vsub.f32 %v180_v10, %v182_v11 }
 0x228   :  { %186 = vst.msk [vmem:[%s333_s3 + $0x8] sm:$0xff] %vm18_vm1, %v184_v12 }

// kernel: model_forward.2
= control target key start
LH: loop header
LB: loop body
LE: loop exit
PB: predicated region body
PF: predicated region fallthrough
CT: control target
= control target key end

     0   :  { %vm17_vm0 = vcmask 254976   ;;  %v341_v0 = vmov 0.0   ;;  %s537_s28 = smov 0   ;;  %s631_s0 = inlined_call_operand.vmem [shape: f32[8,2,32], index: 0, kind: input, shape index: {}]   ;;  %s632_s1 = inlined_call_operand.vmem [shape: f32[128,32], index: 1, kind: input, shape index: {}]   ;;  %s633_s4 = inlined_call_operand.vmem [shape: f32[8,2,32], index: 4, kind: output, shape index: {}]   ;;  %s634_s2 = inlined_call_operand.vmem [shape: f32[128,32], index: 2, kind: input, shape index: {}]   ;;  %s635_s3 = inlined_call_operand.vmem [shape: f32[1,128], index: 3, kind: input, shape index: {}]  }
   0x1   :  { %18 = vst.msk [vmem:[#allocation2] sm:$0x3] %vm17_vm0, %v341_v0  ;;  %v374_v1 = vld [vmem:[%s632_s1] sm:$0xff]  ;;  %v379_v2 = vld [vmem:[%s632_s1 + $0x8] sm:$0xff]  ;;  %v384_v3 = vld [vmem:[%s632_s1 + $0x10] sm:$0xff] }
   0x2   :  { %19 = vst.msk [vmem:[#allocation3] sm:$0x3] %vm17_vm0, %v341_v0  ;;  %v390_v4 = vld [vmem:[%s632_s1 + $0x18] sm:$0xff]  ;;  %v395_v5 = vld [vmem:[%s632_s1 + $0x20] sm:$0xff]  ;;  %v400_v6 = vld [vmem:[%s632_s1 + $0x28] sm:$0xff] }
   0x3   :  { %v405_v7 = vld [vmem:[%s632_s1 + $0x30] sm:$0xff]  ;;  %v410_v8 = vld [vmem:[%s632_s1 + $0x38] sm:$0xff]  ;;  %v415_v9 = vld [vmem:[%s632_s1 + $0x40] sm:$0xff] }
   0x4   :  { %v420_v10 = vld [vmem:[%s632_s1 + $0x48] sm:$0xff]  ;;  %v425_v11 = vld [vmem:[%s632_s1 + $0x50] sm:$0xff]  ;;  %v430_v12 = vld [vmem:[%s632_s1 + $0x58] sm:$0xff] }
   0x5   :  { %v435_v13 = vld [vmem:[%s632_s1 + $0x60] sm:$0xff]  ;;  %v440_v14 = vld [vmem:[%s632_s1 + $0x68] sm:$0xff]  ;;  %v445_v15 = vld [vmem:[%s632_s1 + $0x70] sm:$0xff] }
   0x6   :  { %v450_v16 = vld [vmem:[%s632_s1 + $0x78] sm:$0xff]  ;;  %v455_v17 = vld [vmem:[%s634_s2] sm:$0xff]  ;;  %v460_v18 = vld [vmem:[%s634_s2 + $0x8] sm:$0xff] }
   0x7   :  { %v465_v19 = vld [vmem:[%s634_s2 + $0x10] sm:$0xff]  ;;  %v470_v20 = vld [vmem:[%s634_s2 + $0x18] sm:$0xff]  ;;  %v475_v21 = vld [vmem:[%s634_s2 + $0x20] sm:$0xff] }
   0x8   :  { %v480_v22 = vld [vmem:[%s634_s2 + $0x28] sm:$0xff]  ;;  %v485_v23 = vld [vmem:[%s634_s2 + $0x30] sm:$0xff]  ;;  %v490_v24 = vld [vmem:[%s634_s2 + $0x38] sm:$0xff] }
   0x9   :  { %v495_v25 = vld [vmem:[%s634_s2 + $0x40] sm:$0xff]  ;;  %v500_v26 = vld [vmem:[%s634_s2 + $0x48] sm:$0xff]  ;;  %v505_v27 = vld [vmem:[%s634_s2 + $0x50] sm:$0xff] }
   0xa   :  { %v510_v28 = vld [vmem:[%s634_s2 + $0x58] sm:$0xff]  ;;  %v515_v29 = vld [vmem:[%s634_s2 + $0x60] sm:$0xff]  ;;  %v520_v30 = vld [vmem:[%s634_s2 + $0x68] sm:$0xff] }
   0xb   :  { %v525_v31 = vld [vmem:[%s634_s2 + $0x70] sm:$0xff]  ;;  %v530_v32 = vld [vmem:[%s634_s2 + $0x78] sm:$0xff]  ;;  %v535_v33 = vld [vmem:[%s635_s3] sm:$0x1] }
   0xc LB: > { %vm64_vm1 = vcmask 261120   ;;  %s277_s2 = sshll.u32 %s339_s28, 1  ;;  %v62_v34 = vld [vmem:[#allocation2] sm:$0x3]  ;;  %v208_v36 = vperm.slane %v535_v33, 0  ;;  %s342_s30 = smov 64   ;;  %s339_s28 = sphi %s537_s28, %s58_s28  }
   0xd   : > { %278 = vmatpush.xpose.msk.msra.mxu0 %vm64_vm1, %v530_v32  ;;  %295 = vmatpush.xpose.msk.msra.mxu1 %vm64_vm1, %v450_v16  ;;  %s60_s29 = scalar_lea.vmem %s631_s0, %s277_s2  ;;  %v63_v42 = vld [vmem:[#allocation3] sm:$0x3]  ;;  %s343_s5 = smov 32  }
   0xe   : > { %v61_v35 = vld [vmem:[%s60_s29] sm:$0x3]  ;;  %s344_s6 = smov 96   ;;  %s262_s9 = scalar_lea.vmem %s633_s4, %s277_s2 }
   0xf   : > { %s58_s28 = sadd.s32 1, %s339_s28  }
  0x10   : > { %p55_p0 = scmp.ge.s32.totalorder %s58_s28, 8  }
  0x11   : > { %279 = vmatpush.xpose.msk.msra.mxu0 %vm64_vm1, %v525_v31  ;;  %296 = vmatpush.xpose.msk.msra.mxu1 %vm64_vm1, %v445_v15 }
  0x15   : > { %280 = vmatpush.xpose.msk.msra.mxu0 %vm64_vm1, %v520_v30  ;;  %297 = vmatpush.xpose.msk.msra.mxu1 %vm64_vm1, %v440_v14 }
  0x19   : > { %281 = vmatpush.xpose.msk.msra.mxu0 %vm64_vm1, %v515_v29  ;;  %298 = vmatpush.xpose.msk.msra.mxu1 %vm64_vm1, %v435_v13 }
  0x1d   : > { %282 = vmatpush.xpose.msk.msra.mxu0 %vm64_vm1, %v510_v28  ;;  %299 = vmatpush.xpose.msk.msra.mxu1 %vm64_vm1, %v430_v12 }
  0x21   : > { %283 = vmatpush.xpose.msk.msra.mxu0 %vm64_vm1, %v505_v27  ;;  %300 = vmatpush.xpose.msk.msra.mxu1 %vm64_vm1, %v425_v11 }
  0x25   : > { %284 = vmatpush.xpose.msk.msra.mxu0 %vm64_vm1, %v500_v26  ;;  %301 = vmatpush.xpose.msk.msra.mxu1 %vm64_vm1, %v420_v10 }
  0x29   : > { %285 = vmatpush.xpose.msk.msra.mxu0 %vm64_vm1, %v495_v25  ;;  %302 = vmatpush.xpose.msk.msra.mxu1 %vm64_vm1, %v415_v9 }
  0x2d   : > { %286 = vmatpush.xpose.msk.msra.mxu0 %vm64_vm1, %v490_v24  ;;  %303 = vmatpush.xpose.msk.msra.mxu1 %vm64_vm1, %v410_v8 }
  0x31   : > { %287 = vmatpush.xpose.msk.msra.mxu0 %vm64_vm1, %v485_v23  ;;  %304 = vmatpush.xpose.msk.msra.mxu1 %vm64_vm1, %v405_v7 }
  0x35   : > { %288 = vmatpush.xpose.msk.msra.mxu0 %vm64_vm1, %v480_v22  ;;  %305 = vmatpush.xpose.msk.msra.mxu1 %vm64_vm1, %v400_v6 }
  0x39   : > { %289 = vmatpush.xpose.msk.msra.mxu0 %vm64_vm1, %v475_v21  ;;  %306 = vmatpush.xpose.msk.msra.mxu1 %vm64_vm1, %v395_v5 }
  0x3d   : > { %290 = vmatpush.xpose.msk.msra.mxu0 %vm64_vm1, %v470_v20  ;;  %307 = vmatpush.xpose.msk.msra.mxu1 %vm64_vm1, %v390_v4 }
  0x41   : > { %291 = vmatpush.xpose.msk.msra.mxu0 %vm64_vm1, %v465_v19  ;;  %308 = vmatpush.xpose.msk.msra.mxu1 %vm64_vm1, %v384_v3 }
  0x45   : > { %292 = vmatpush.xpose.msk.msra.mxu0 %vm64_vm1, %v460_v18  ;;  %309 = vmatpush.xpose.msk.msra.mxu1 %vm64_vm1, %v379_v2 }
  0x49   : > { %293 = vmatpush.xpose.msk.msra.mxu0 %vm64_vm1, %v455_v17  ;;  %310 = vmatpush.xpose.msk.msra.mxu1 %vm64_vm1, %v374_v1 }
  0x4c   : > { %294 = vmatmul.msk.f32.vlgmr.msra.gmra.mxu0 %vm64_vm1, %v62_v34  ;;  %311 = vmatmul.msk.f32.vlgmr.msra.gmra.mxu1 %vm64_vm1, %v61_v35 }
  0xc9   : > { %v133_v37 = vpop.f32.mrf.mxu0  ;;  %v204_v38 = vpop.f32.mrf.mxu1 }
  0xca   : > { %v205_v39 = vadd.f32 %v204_v38, %v133_v37 }
  0xcc   : > { %v210_v40 = vadd.f32 %v208_v36, %v205_v39 }
  0xce   : > { %325 = vtanh.f32 %v210_v40  ;;  %v312_v43 = vmul.f32 -1.442695, %v210_v40 }
  0xd0   : > { %327 = vpow2.f32 %v312_v43 }
  0xd4   : > { %v326_v41 = vpop.eup %325 }
  0xd5   : > { %237 = vrot.lane.b32.xlu0 %v326_v41, %s342_s30 }
  0xd6   : > { %v328_v44 = vpop.eup %327 }
  0xd7   : > { %v214_v45 = vadd.f32 1.0, %v328_v44 }
  0xd9   : > { %329 = vrcp.f32 %v214_v45  ;;  %v226_v51 = vand.u32 2147483648, %v214_v45  ;;  %vm220_vm3 = vweird.f32 %v214_v45  ;;  %v224_v52 = vand.u32 2147483647, %v214_v45 }
  0xdb   : > { %v227_v54 = vor.u32 1.1754944e-38, %v226_v51  ;;  %vm225_vm5 = vcmp.eq.f32.partialorder %v224_v52, 8.507059e+37 }
  0xdd   : > { %232 = vrot.lane.b32.xlu0 %v63_v42, %s343_s5 }
  0xdf   : > { %v330_v46 = vpop.eup %329 }
  0xe0   : > { %v216_v47 = vmul.f32 %v330_v46, %v214_v45  ;;  %vm221_vm2 = vweird.f32 %v330_v46 }
  0xe1   : > { %vm222_vm4 = vmor %vm220_vm3, %vm221_vm2 }
  0xe2   : > { %v217_v48 = vsub.f32 1.0, %v216_v47 }
  0xe4   : > { %v218_v49 = vmul.f32 %v330_v46, %v217_v48 }
  0xe6   : > { %v219_v50 = vadd.f32 %v330_v46, %v218_v49 }
  0xe8   : > { %v223_v53 = vsel %vm222_vm4, %v330_v46, %v219_v50 }
  0xe9   : > { %v228_v56 = vsel %vm225_vm5, %v227_v54, %v223_v53 }
 0x147   : > { %v238_v55 = vpop.permute.xlu0 %237 }
 0x148   : > { %v240_v57 = vmul.f32 %v238_v55, %v228_v56 }
 0x14a   : > { %242 = vrot.lane.b32.xlu1 %v240_v57, %s343_s5 }
 0x14f   : > { %v233_v58 = vpop.permute.xlu0 %232 }
 0x150   : > { %v235_v59 = vmul.f32 %v233_v58, %v228_v56 }
 0x1bc   : > { %v243_v60 = vpop.permute.xlu1 %242 }
 0x1bd   : > { %v245_v61 = vadd.f32 %v243_v60, %v235_v59 }
 0x1bf   : > { %331 = vtanh.f32 %v245_v61  ;;  %253 = vrot.lane.b32.xlu2 %v245_v61, %s344_s6 }
 0x1c5   : > { %v332_v62 = vpop.eup %331 }
 0x1c6   : > { %248 = vrot.lane.b32.xlu1 %v332_v62, %s342_s30 }
 0x219   : > { %v254_v63 = vpop.permute.xlu2 %253 }
 0x21a   : > { %256 = vst.msk [vmem:[#allocation3] sm:$0x3] %vm17_vm0, %v254_v63 }
 0x238   : > { %v249_v0 = vpop.permute.xlu1 %248 }
 0x239   : > { %v251_v34 = vmul.f32 %v249_v0, %v228_v56 }
 0x23b   : > { %258 = vrot.lane.b32.xlu2 %v251_v34, %s343_s5 }
 0x293   :  { %57 = sbr.rel (!%p55_p0) target bundleno = 12 (0xc), region = 45 }
 0x295   : > { %v259_v35 = vpop.permute.xlu2 %258 }
 0x296   : > { %261 = vst.msk [vmem:[#allocation2] sm:$0x3] %vm17_vm0, %v259_v35 }
 0x297   : > { %263 = vst.msk [vmem:[%s262_s9] sm:$0x3] %vm17_vm0, %v259_v35 }

</bundles_post_ra>
